<compile_context>
chip_gen: v7x
topology: tpu7x:2x2x1
jax: 0.10.0
libtpu: 0.0.40
codegen_flags: <defaults>
</compile_context>

<pallas_src>
import functools
import math

import jax
import jax.numpy as jnp
from jax.experimental import pallas as pl
from jax.experimental.pallas import tpu as pltpu


def _round_up(x, m):
    return ((x + m - 1) // m) * m


# --------------------------- per-chip tile plan -----------------------------

def _chip_plan():
    """Returns (TM_max, TN_max, TK_max, vmem_limit_bytes, is_v7x)."""
    try:
        kind = jax.devices()[0].device_kind.lower()
    except Exception:  # defensive: fall back to a conservative plan
        kind = ""
    if "7x" in kind or "v7" in kind:
        # v7x needs only ~310 FLOP/byte: 768^2 tiles reach the MXU roofline
        # while staying well inside the 64 MiB/TC VMEM.
        return 768, 768, 512, 48 << 20, True
    if "v6" in kind or "trillium" in kind:
        # v6e has the widest MXU:HBM ratio -> 1024-class tiles, raised scoped VMEM.
        return 1024, 1024, 1024, 64 << 20, False
    if "v5 lite" in kind or "v5e" in kind or "v5litepod" in kind:
        # v5e: 512^3 is already MXU-bound and fits the 16 MiB default budget.
        return 512, 512, 512, None, False
    return 512, 512, 512, None, False


# ----------------------------- Pallas kernels -------------------------------

def _make_kernel(has_bias, multi_k):
    """Build the matmul kernel variant for (bias?, multiple K steps?)."""
    if multi_k:
        if has_bias:
            def kernel(x_ref, w_ref, b_ref, o_ref, acc_ref):
                k_id = pl.program_id(2)

                @pl.when(k_id == 0)
                def _init():
                    acc_ref[...] = jnp.zeros_like(acc_ref)

                acc_ref[...] += jnp.dot(x_ref[...], w_ref[...],
                                        preferred_element_type=jnp.float32)

                # Bias is added exactly once, on the last K step.
                @pl.when(k_id == pl.num_programs(2) - 1)
                def _epilogue():
                    o_ref[...] = (acc_ref[...]
                                  + b_ref[...].astype(jnp.float32)
                                  ).astype(o_ref.dtype)
        else:
            def kernel(x_ref, w_ref, o_ref, acc_ref):
                k_id = pl.program_id(2)

                @pl.when(k_id == 0)
                def _init():
                    acc_ref[...] = jnp.zeros_like(acc_ref)

                acc_ref[...] += jnp.dot(x_ref[...], w_ref[...],
                                        preferred_element_type=jnp.float32)

                @pl.when(k_id == pl.num_programs(2) - 1)
                def _epilogue():
                    o_ref[...] = acc_ref[...].astype(o_ref.dtype)
    else:
        # Single K step: skip the f32 VMEM accumulator entirely.
        if has_bias:
            def kernel(x_ref, w_ref, b_ref, o_ref):
                acc = jnp.dot(x_ref[...], w_ref[...],
                              preferred_element_type=jnp.float32)
                o_ref[...] = (acc + b_ref[...].astype(jnp.float32)
                              ).astype(o_ref.dtype)
        else:
            def kernel(x_ref, w_ref, o_ref):
                o_ref[...] = jnp.dot(x_ref[...], w_ref[...],
                                     preferred_element_type=jnp.float32
                                     ).astype(o_ref.dtype)
    return kernel


# ------------------------------ tiled wrapper --------------------------------

@functools.partial(jax.jit,
                   static_argnames=("n", "tm", "tn", "tk", "out_dtype",
                                    "vmem_limit", "has_bias"))
def _tiled_linear(x2d, wt_padded, bias2d, *, n, tm, tn, tk, out_dtype,
                  vmem_limit, has_bias):
    """x2d:(M,K) @ wt_padded:(K_pad,N_pad) [+ bias2d:(1,N_pad)] -> (M, n)."""
    m, k = x2d.shape
    k_pad, n_pad = wt_padded.shape

    # Only K is explicitly zero-padded (required for reduction correctness);
    # M / N ragged edges are handled by Pallas block masking - no extra HBM
    # pad passes over X and no trailing output slice.
    if k_pad != k:
        x2d = jnp.pad(x2d, ((0, 0), (0, k_pad - k)))

    m_tiles = pl.cdiv(m, tm)
    n_tiles = pl.cdiv(n, tn)
    k_tiles = k_pad // tk
    multi_k = k_tiles > 1

    kernel = _make_kernel(has_bias, multi_k)

    x_bytes = m * k_pad * x2d.dtype.itemsize
    w_bytes = k_pad * n_pad * wt_padded.dtype.itemsize
    o_bytes = m * n * jnp.dtype(out_dtype).itemsize
    cost = pl.CostEstimate(
        flops=2 * m * n_pad * k_pad,
        transcendentals=0,
        # account for re-streaming: x once per N tile, weight once per M tile
        bytes_accessed=x_bytes * n_tiles + w_bytes * m_tiles + o_bytes)

    if multi_k:
        grid = (m_tiles, n_tiles, k_tiles)
        in_specs = [pl.BlockSpec((tm, tk), lambda i, j, kk: (i, kk)),
                    pl.BlockSpec((tk, tn), lambda i, j, kk: (kk, j))]
        if has_bias:
            in_specs.append(pl.BlockSpec((1, tn), lambda i, j, kk: (0, j)))
        out_spec = pl.BlockSpec((tm, tn), lambda i, j, kk: (i, j))
        scratch = [pltpu.VMEM((tm, tn), jnp.float32)]
        semantics = ("parallel", "parallel", "arbitrary")
    else:
        grid = (m_tiles, n_tiles)
        in_specs = [pl.BlockSpec((tm, tk), lambda i, j: (i, 0)),
                    pl.BlockSpec((tk, tn), lambda i, j: (0, j))]
        if has_bias:
            in_specs.append(pl.BlockSpec((1, tn), lambda i, j: (0, j)))
        out_spec = pl.BlockSpec((tm, tn), lambda i, j: (i, j))
        scratch = []
        semantics = ("parallel", "parallel")

    args = (x2d, wt_padded) + ((bias2d,) if has_bias else ())

    return pl.pallas_call(
        kernel,
        out_shape=jax.ShapeDtypeStruct((m, n), out_dtype),
        grid_spec=pltpu.PrefetchScalarGridSpec(
            num_scalar_prefetch=0,
            grid=grid,
            in_specs=in_specs,
            out_specs=out_spec,
            scratch_shapes=scratch),
        compiler_params=pltpu.CompilerParams(
            dimension_semantics=semantics,
            vmem_limit_bytes=vmem_limit),
        cost_estimate=cost,
    )(*args)


# ------------------------------ Python module --------------------------------

class RowParallelLinear:
    """JAX/Pallas port of megatron.mpu.layers.RowParallelLinear.

    world_size is fixed to 1 here, so:
      * input_size_per_partition == input_size
      * scatter_to_tensor_model_parallel_region == identity
      * reduce_from_tensor_model_parallel_region == identity
    # TODO(synk): multi-device all-reduce (reduce_from_tensor_model_parallel_region)
    # would need shard_map / pltpu.make_async_remote_copy; identity for world_size=1.
    """

    def __init__(self, input_size, output_size, bias=True,
                 input_is_parallel=False, stride=1, skip_bias_add=False,
                 params_dtype=jnp.float32, compute_dtype=jnp.bfloat16,
                 key=None):
        self.input_size = input_size
        self.output_size = output_size
        self.input_is_parallel = input_is_parallel
        self.skip_bias_add = skip_bias_add
        self.input_size_per_partition = input_size  # world_size == 1
        self.compute_dtype = compute_dtype

        # Per-generation tile plan, clamped to the problem size.
        tm_max, tn_max, tk_max, vmem_limit, is_v7x = _chip_plan()
        self._tm_max = tm_max
        self._is_v7x = is_v7x
        self._vmem_limit = vmem_limit
        self.tn = min(tn_max, _round_up(output_size, 128))
        self.tk = min(tk_max, _round_up(input_size, 128))
        self._k_pad = _round_up(input_size, self.tk)
        self._n_pad = _round_up(output_size, self.tn)

        if key is None:
            key = jax.random.PRNGKey(0)
        # xavier_normal_ on the master weight (output_size, input_size):
        # std = gain * sqrt(2 / (fan_in + fan_out)), gain = 1.
        std = math.sqrt(2.0 / (input_size + output_size))
        self.weight = (std * jax.random.normal(
            key, (output_size, self.input_size_per_partition),
            dtype=jnp.float32)).astype(params_dtype)

        # Transposed, MXU-dtype, tile-padded weight built ONCE: (K_pad, N_pad).
        wt = self.weight.T.astype(compute_dtype)
        self.weight_t = jnp.pad(
            wt, ((0, self._k_pad - input_size), (0, self._n_pad - output_size)))

        self.bias = (jnp.zeros((output_size,), dtype=params_dtype)
                     if bias else None)
        self._refresh_bias()

    def load_bias(self, bias):
        """Replace the bias vector and rebuild its padded f32 copy."""
        self.bias = bias
        self._refresh_bias()

    def _refresh_bias(self):
        if self.bias is None:
            self._bias2d = None
        else:
            b = self.bias.astype(jnp.float32).reshape(1, self.output_size)
            self._bias2d = jnp.pad(
                b, ((0, 0), (0, self._n_pad - self.output_size)))

    def __call__(self, input_):
        # input_: (..., input_size)  ->  output: (..., output_size)
        *lead, k = input_.shape
        assert k == self.input_size_per_partition
        m = 1
        for d in lead:
            m *= d
        x2d = input_.reshape(m, k).astype(self.compute_dtype)

        # bf16 packs 16 rows per sublane tile -> round small-M tiles to 16.
        tm = min(self._tm_max, _round_up(m, 16))
        tn = self.tn
        # v7x megacore: ensure the parallel grid axes expose >= 2 tiles total
        # so both TensorCores get work.
        if (self._is_v7x and pl.cdiv(m, tm) == 1
                and pl.cdiv(self.output_size, tn) == 1
                and tn >= 256 and (tn // 2) % 128 == 0):
            tn //= 2

        add_bias = (self.bias is not None) and (not self.skip_bias_add)

        out2d = _tiled_linear(
            x2d, self.weight_t, self._bias2d if add_bias else None,
            n=self.output_size, tm=tm, tn=tn, tk=self.tk,
            out_dtype=input_.dtype, vmem_limit=self._vmem_limit,
            has_bias=add_bias)

        output = out2d.reshape(*lead, self.output_size)
        output_bias = self.bias if self.skip_bias_add else None
        return output, output_bias


# --------------------------------- driver ------------------------------------

if __name__ == "__main__":
    key = jax.random.PRNGKey(0)
    k_x, k_w, k_b, k_x2, k_w2 = jax.random.split(key, 5)

    batch, seq, input_size, output_size = 2, 8, 32, 16
    x = jax.random.normal(k_x, (batch, seq, input_size), dtype=jnp.float32)

    def ref_linear(x_, w_t_bf16, b_):
        # Mirrors the kernel's mixed precision: bf16 operands, f32 accumulate.
        xr = x_.reshape(-1, x_.shape[-1]).astype(jnp.bfloat16).astype(jnp.float32)
        wr = w_t_bf16.astype(jnp.float32)
        out = xr @ wr
        if b_ is not None:
            out = out + b_.astype(jnp.float32)
        return out.reshape(*x_.shape[:-1], wr.shape[-1])

    # --- path 1: bias added in the kernel epilogue (non-zero bias) ---
    layer = RowParallelLinear(input_size, output_size, bias=True,
                              skip_bias_add=False, key=k_w)
    layer.load_bias(jax.random.normal(k_b, (output_size,), dtype=jnp.float32))
    out, out_bias = layer(x)
    out = jax.block_until_ready(out)
    w_t_bf16 = layer.weight.T.astype(jnp.bfloat16)
    ref = ref_linear(x, w_t_bf16, layer.bias)
    assert out.shape == (batch, seq, output_size)
    assert out_bias is None
    assert jnp.allclose(out, ref, atol=2e-3, rtol=2e-3), \
        float(jnp.max(jnp.abs(out - ref)))

    # --- path 2: skip_bias_add=True (bias returned, not added; no-bias kernel) ---
    layer2 = RowParallelLinear(input_size, output_size, bias=True,
                               skip_bias_add=True, key=k_w)
    out2, out_bias2 = layer2(x)
    out2 = jax.block_until_ready(out2)
    ref2 = ref_linear(x, w_t_bf16, None)
    assert out_bias2 is not None and out_bias2.shape == (output_size,)
    assert jnp.allclose(out2, ref2, atol=2e-3, rtol=2e-3)

    # --- path 3: multi-step K reduction (exercises the f32 accumulator kernel) ---
    m3, k3, n3 = 16, 256, 128
    x3 = jax.random.normal(k_x2, (m3, k3), dtype=jnp.float32).astype(jnp.bfloat16)
    w3 = (0.05 * jax.random.normal(k_w2, (k3, n3), dtype=jnp.float32)
          ).astype(jnp.bfloat16)
    b3 = 0.01 * jnp.arange(n3, dtype=jnp.float32).reshape(1, n3)
    out3 = _tiled_linear(x3, w3, b3, n=n3, tm=16, tn=128, tk=128,
                         out_dtype=jnp.float32, vmem_limit=None, has_bias=True)
    out3 = jax.block_until_ready(out3)
    ref3 = x3.astype(jnp.float32) @ w3.astype(jnp.float32) + b3
    assert jnp.allclose(out3, ref3, atol=2e-3, rtol=2e-3)

    print("KERNEL_OK")
</pallas_src>

<mosaic_0001>
module attributes {stable_mosaic.version = 11 : i64} {
  func.func @kernel(%arg0: i32, %arg1: i32, %arg2: memref<16x128xbf16, #tpu.memory_space<vmem>>, %arg3: memref<128x128xbf16, #tpu.memory_space<vmem>>, %arg4: memref<1x128xf32, #tpu.memory_space<vmem>>, %arg5: memref<16x128xf32, #tpu.memory_space<vmem>>) attributes {dimension_semantics = [#tpu.dimension_semantics<parallel>, #tpu.dimension_semantics<parallel>], iteration_bounds = array<i64: 1, 1>, scalar_prefetch = 0 : i64, scratch_operands = 0 : i64, tpu.core_type = #tpu.core_type<tc>, window_params = [{transform_indices = @transform_0, window_bounds = array<i64: 16, 128>}, {transform_indices = @transform_1, window_bounds = array<i64: 128, 128>}, {transform_indices = @transform_2, window_bounds = array<i64: 1, 128>}, {transform_indices = @transform_3, window_bounds = array<i64: 16, 128>}]} {
    %c0 = arith.constant 0 : index
    %c0_0 = arith.constant 0 : index
    %0 = vector.load %arg2[%c0, %c0_0] : memref<16x128xbf16, #tpu.memory_space<vmem>>, vector<16x128xbf16>
    %c0_1 = arith.constant 0 : index
    %c0_2 = arith.constant 0 : index
    %1 = vector.load %arg3[%c0_1, %c0_2] : memref<128x128xbf16, #tpu.memory_space<vmem>>, vector<128x128xbf16>
    %cst = arith.constant dense<0.000000e+00> : vector<16x128xf32>
    %2 = tpu.matmul %0, %1, %cst {dimension_numbers = #tpu.dot_dimension_numbers<[1], [0], [0], [1], [0, 0, 1, 1], [], []>} : vector<16x128xbf16>, vector<128x128xbf16>, vector<16x128xf32> -> vector<16x128xf32>
    %c0_3 = arith.constant 0 : index
    %c0_4 = arith.constant 0 : index
    %3 = vector.load %arg4[%c0_3, %c0_4] : memref<1x128xf32, #tpu.memory_space<vmem>>, vector<1x128xf32>
    %4 = vector.broadcast %3 : vector<1x128xf32> to vector<16x128xf32>
    %5 = arith.addf %2, %4 : vector<16x128xf32>
    %c0_5 = arith.constant 0 : index
    %c0_6 = arith.constant 0 : index
    %6 = vector.load %arg5[%c0_5, %c0_6] : memref<16x128xf32, #tpu.memory_space<vmem>>, vector<16x128xf32>
    tpu.vector_store %arg5[%c0_5, %c0_6], %5 {strides = array<i32>} : memref<16x128xf32, #tpu.memory_space<vmem>>, vector<16x128xf32>,
    return
  }
  func.func @transform_0(%arg0: i32, %arg1: i32) -> (i32, i32) {
    %c0_i32 = arith.constant 0 : i32
    %c0_i32_0 = arith.constant 0 : i32
    return %arg0, %c0_i32 : i32, i32
  }
  func.func @transform_1(%arg0: i32, %arg1: i32) -> (i32, i32) {
    %c0_i32 = arith.constant 0 : i32
    %c0_i32_0 = arith.constant 0 : i32
    return %c0_i32, %arg1 : i32, i32
  }
  func.func @transform_2(%arg0: i32, %arg1: i32) -> (i32, i32) {
    %c0_i32 = arith.constant 0 : i32
    %c0_i32_0 = arith.constant 0 : i32
    return %c0_i32, %arg1 : i32, i32
  }
  func.func @transform_3(%arg0: i32, %arg1: i32) -> (i32, i32) {
    %c0_i32 = arith.constant 0 : i32
    return %arg0, %arg1 : i32, i32
  }
}

</mosaic_0001>

<bundles_post_ra>
// kernel: _tiled_linear.1
= control target key start
LH: loop header
LB: loop body
LE: loop exit
PB: predicated region body
PF: predicated region fallthrough
CT: control target
= control target key end

     0   :  { %8 = vsyncpa [#allocation3], 0  ;;  %s331_s0 = inlined_call_operand.vmem [shape: bf16[16,128], index: 0, kind: input, shape index: {}]   ;;  %s332_s1 = inlined_call_operand.hbm [shape: bf16[128,128], index: 1, kind: input, shape index: {}]   ;;  %s333_s2 = inlined_call_operand.vmem [shape: f32[1,128], index: 2, kind: input, shape index: {}]   ;;  %s334_s3 = inlined_call_operand.hbm [shape: f32[16,16], index: 3, kind: output, shape index: {}]  }
   0x1   :  { %9 = vsyncpa [#allocation4], 0  ;;  %s273_s12 = smov [#allocation2]   ;;  %s225_s16 = scalar_lea.hbm %s332_s1, 1024 }
   0x2   :  { %s17_s13 = sshll.u32 %s273_s12, 4  ;;  %p226_p0 = scmp.ne.s32.totalorder %s332_s1, %s225_s16  ;;  %s18_s13 = int_to_ptr.vmem [resolvable:$true] %s17_s13 }
   0x3   :  { %p229_p1 = scmp.lt.u32.totalorder %s225_s16, %s332_s1 }
   0x5   :  { %p231_p2 = pnand %p229_p1, %p226_p0 }
   0x7   :  { %234 = shalt.err (!%p231_p2)
}
   0x8   :  { %s235_s21 = scalar_lea.vmem %s18_s13, 1024  ;;  %p240_p4 = scmp.lt.s32.totalorder %s18_s13, %s18_s13 }
   0x9   :  { %p236_p3 = scmp.ne.s32.totalorder %s18_s13, %s235_s21  ;;  %p241_p5 = scmp.lt.s32.totalorder %s235_s21, %s235_s21 }
   0xb   :  { %p242_p6 = por %p241_p5, %p240_p4 }
   0xd   :  { %p243_p7 = pnand %p242_p6, %p236_p3 }
   0xf   :  { %246 = shalt.err (!%p243_p7)
}
  0x10   :  { %s274_s22 = smov 64   ;;  %s275_s23 = smov 4  }
  0x11   :  { %23 = dma.hbm_to_vmem [thread:$0]  %s332_s1, 1024, %s18_s13, [#allocation3], %s274_s22, %s274_s22, %s275_s23  }
  0x12   :  { %269 = dma.done.wait [#allocation3], 1024  }
  0x13   :  { %270 = vsyncadd [#allocation3], 4294966272  ;;  %v276_v0 = vmov 0.0   ;;  %vm277_vm0 = vmmov 0   ;;  %v216_v1 = vld [vmem:[#allocation2] sm:$0xff]   ;;  %v217_v2 = vld [vmem:[#allocation2 + $0x8] sm:$0xff]  }
  0x14   :  { %188 = vmatprep.subr.bf16.mxu0 %v276_v0  ;;  %204 = vmatprep.mubr.msk.bf16.mxu0 %vm277_vm0, %v276_v0  ;;  %v218_v3 = vld [vmem:[#allocation2 + $0x10] sm:$0xff]   ;;  %v219_v4 = vld [vmem:[#allocation2 + $0x18] sm:$0xff]   ;;  %v220_v5 = vld [vmem:[#allocation2 + $0x20] sm:$0xff]   ;;  %s278_s29 = smov [#allocation5]  }
  0x15   :  { %189 = vmatpush3.bf16.msra.mxu0 %v216_v1  ;;  %v221_v6 = vld [vmem:[#allocation2 + $0x28] sm:$0xff]   ;;  %v222_v7 = vld [vmem:[#allocation2 + $0x30] sm:$0xff]   ;;  %v223_v8 = vld [vmem:[#allocation2 + $0x38] sm:$0xff]   ;;  %s157_s30 = sshll.u32 %s278_s29, 4  ;;  %s158_s30 = int_to_ptr.vmem [resolvable:$true] %s157_s30 }
  0x16   :  { %190 = vmatprep.subr.bf16.mxu0 %v276_v0  ;;  %v224_v9 = vld [vmem:[%s331_s0] sm:$0xff]   ;;  %s247_s4 = scalar_lea.vmem %s158_s30, 256  ;;  %p252_p9 = scmp.lt.s32.totalorder %s158_s30, %s158_s30 }
  0x17   :  { %v169_v10 = vld [vmem:[%s333_s2] ss:$0 sm:$0xff]  ;;  %p248_p8 = scmp.ne.s32.totalorder %s158_s30, %s247_s4  ;;  %p253_p10 = scmp.lt.s32.totalorder %s247_s4, %s247_s4 }
  0x19   :  { %191 = vmatpush3.bf16.msra.mxu0 %v217_v2  ;;  %p254_p11 = por %p253_p10, %p252_p9 }
  0x1a   :  { %192 = vmatprep.subr.bf16.mxu0 %v276_v0 }
  0x1b   :  { %p255_p12 = pnand %p254_p11, %p248_p8 }
  0x1d   :  { %193 = vmatpush3.bf16.msra.mxu0 %v218_v3 }
  0x1e   :  { %194 = vmatprep.subr.bf16.mxu0 %v276_v0 }
  0x21   :  { %195 = vmatpush3.bf16.msra.mxu0 %v219_v4 }
  0x22   :  { %196 = vmatprep.subr.bf16.mxu0 %v276_v0 }
  0x25   :  { %197 = vmatpush3.bf16.msra.mxu0 %v220_v5 }
  0x26   :  { %198 = vmatprep.subr.bf16.mxu0 %v276_v0 }
  0x29   :  { %199 = vmatpush3.bf16.msra.mxu0 %v221_v6 }
  0x2a   :  { %200 = vmatprep.subr.bf16.mxu0 %v276_v0 }
  0x2d   :  { %201 = vmatpush3.bf16.msra.mxu0 %v222_v7 }
  0x2e   :  { %202 = vmatprep.subr.bf16.mxu0 %v276_v0 }
  0x31   :  { %203 = vmatpush3.bf16.msra.mxu0 %v223_v8 }
  0x34   :  { %205 = vmatmul.mubr.bf16.vlgmr.msra.gmra.mrb[0].mxu0 %v224_v9 }
 0x107   :  { %v143_v11 = vpop.f32.mrb[0].mxu0 }
 0x108   :  { %v144_v12 = vadd.f32 %v169_v10, %v143_v11  ;;  %v206_v13 = vpop.f32.mrb[1].mxu0 }
 0x109   :  { %v146_v14 = vpop.f32.mrb[2].mxu0 }
 0x10a   :  { %150 = vst [vmem:[#allocation5] sm:$0xff] %v144_v12  ;;  %v147_v15 = vadd.f32 %v169_v10, %v146_v14  ;;  %v207_v16 = vpop.f32.mrb[3].mxu0 }
 0x10c   :  { %151 = vst [vmem:[#allocation5 + $0x8] sm:$0xff] %v147_v15 }
 0x10d   :  { %258 = shalt.err (!%p255_p12)
}
 0x10e   :  { %s259_s5 = scalar_lea.hbm %s334_s3, 256 }
 0x10f   :  { %p260_p13 = scmp.ne.s32.totalorder %s334_s3, %s259_s5  ;;  %p263_p0 = scmp.lt.u32.totalorder %s259_s5, %s334_s3 }
 0x111   :  { %p265_p1 = pnand %p263_p0, %p260_p13 }
 0x113   :  { %268 = shalt.err (!%p265_p1)
}
 0x114   :  { %s279_s10 = smov 128   ;;  %s280_s11 = smov 8  }
 0x115   :  { %163 = dma.vmem_to_hbm [thread:$0]  %s158_s30, 256, %s334_s3, [#allocation4], %s279_s10, %s279_s10, %s280_s11  }
 0x116   :  { %271 = dma.done.wait [#allocation4], 256  }
 0x117   :  { %272 = vsyncadd [#allocation4], 4294967040 }
 0x118   :  { %167 = vsyncpa [#allocation3], 1 }
 0x119   :  { %168 = vsyncpa [#allocation4], 1 }

</bundles_post_ra>
